<compile_context>
chip_gen: v5e
topology: v5e:2x2
jax: 0.10.0
libtpu: 0.0.40
codegen_flags: <defaults>
</compile_context>

<pallas_src>
import functools

import jax
import jax.numpy as jnp
import numpy as np
from jax import lax
from jax.experimental import pallas as pl
from jax.experimental.pallas import tpu as pltpu


def _lshift(x, off, size):
    """result[..., j] = x[..., (j + off) % size]  (static lane roll, XLU)."""
    if off == 0:
        return x
    return pltpu.roll(x, shift=size - off, axis=x.ndim - 1)


def _rsqrt_refined(x):
    """rsqrt with one Newton step (closer parity with the 1/sqrt reference)."""
    y = lax.rsqrt(x)
    return y * (1.5 - 0.5 * x * y * y)


def _matching_kernel(f1_ref, f2_ref, out_ref, s1_ref, s2_ref, *,
                     patch, dil, wp, spad, p2, p2pad, compute_dtype):
    """One (batch, C-chunk) grid step.

    f1_ref : (1, Ct, Spad)   feature1, embedded at flat positions y*Wp + x
    f2_ref : (1, Ct, Spad)   feature2, embedded at flat positions (y+D)*Wp + (x+D)
    out_ref: (1, P2pad, Spad) f32 resident block: raw-corr accumulator, then
             relu(normalized corr) at the last C step
    s1_ref : (1, Spad) f32   sum_c f1^2 accumulator
    s2_ref : (1, Spad) f32   sum_c f2^2 accumulator
    """
    c_idx = pl.program_id(1)
    eps = 1e-6
    offs = [(pi * dil) * wp + pj * dil
            for pi in range(patch) for pj in range(patch)]

    @pl.when(c_idx == 0)
    def _():
        out_ref[...] = jnp.zeros_like(out_ref)
        s1_ref[...] = jnp.zeros_like(s1_ref)
        s2_ref[...] = jnp.zeros_like(s2_ref)

    f1 = f1_ref[0]                                   # (Ct, Spad)
    f2 = f2_ref[0]                                   # (Ct, Spad)
    if f1.dtype != compute_dtype:
        f1 = f1.astype(compute_dtype)
        f2 = f2.astype(compute_dtype)

    # Squared-norm accumulation for deferred L2 normalisation (f32 accumulate).
    s1_ref[...] += jnp.sum(f1 * f1, axis=0, keepdims=True, dtype=jnp.float32)
    s2_ref[...] += jnp.sum(f2 * f2, axis=0, keepdims=True, dtype=jnp.float32)

    # Raw correlation, accumulated straight into the resident output block in
    # sublane-aligned groups of 8 rows (bounded live set, wide aligned stores).
    n_groups = p2pad // 8
    for g in range(n_groups):
        rows = []
        row = None
        for r in range(8):
            idx = g * 8 + r
            if idx < p2:
                row = jnp.sum(f1 * _lshift(f2, offs[idx], spad),
                              axis=0, keepdims=True, dtype=jnp.float32)
            # padding rows reuse the previous row object (no extra compute);
            # they are sliced away by the wrapper.
            rows.append(row)
        out_ref[0, pl.ds(g * 8, 8), :] += jnp.concatenate(rows, axis=0)

    @pl.when(c_idx == pl.num_programs(1) - 1)
    def _():
        inv1 = _rsqrt_refined(s1_ref[...] + eps)              # (1, Spad), EUP
        inv2 = _rsqrt_refined(s2_ref[...] + eps)              # (1, Spad), EUP
        shifted = [_lshift(inv2, off, spad) for off in offs]
        shifted = shifted + [shifted[-1]] * (p2pad - p2)
        inv2_rows = jnp.concatenate(shifted, axis=0)          # (P2pad, Spad)
        corr = out_ref[0] * (inv1 * inv2_rows)
        out_ref[0] = jnp.maximum(corr, 0.0).astype(out_ref.dtype)


def _pick_c_chunk(C, spad, p2pad, in_itemsize, budget_bytes):
    """Largest multiple-of-8 channel chunk whose pipelined footprint fits the
    budget.  C is zero-padded by the wrapper up to n_c * Ct, so the budget is
    always honored (no fallback to full-C blocks)."""
    c8 = ((C + 7) // 8) * 8
    # resident output block (x2 buffers) + the two (padded) norm-scratch rows
    fixed = 2 * p2pad * spad * 4 + 2 * 8 * spad * 4
    # 2 inputs, double-buffered, per channel + ~3 f32 compute temporaries
    per_c = 2 * 2 * spad * in_itemsize + 3 * spad * 4
    avail = budget_bytes - fixed
    ct = (avail // per_c) // 8 * 8 if avail > 0 else 0
    ct = max(8, min(c8, ct))
    n_c = -(-c8 // ct)
    # Rebalance: spread channels evenly over n_c steps (fewer wasted zeros).
    ct = ((-(-c8 // n_c) + 7) // 8) * 8
    n_c = -(-c8 // ct)
    return n_c, ct


def matching_layer_scs(feature1, feature2, *, ks=1, patch=3, stride=1, pad=0,
                       patch_dilation=1):
    """JAX/Pallas equivalent of Matching_layer_scs.forward.

    feature1, feature2: (B, C, H, W) arrays (NCHW, like PyTorch).
    Returns: (B, patch*patch, H*W) float32.
    """
    assert ks == 1 and stride == 1 and pad == 0, "only ks=1/stride=1/pad=0 supported"
    B, C, H, W = feature1.shape
    assert feature2.shape == (B, C, H, W)

    dil = patch_dilation
    D = (patch // 2) * dil
    Hp, Wp = H + 2 * D, W + 2 * D
    Sp = Hp * Wp
    Spad = ((Sp + 127) // 128) * 128
    P2 = patch * patch
    P2pad = ((P2 + 7) // 8) * 8

    # Roll-safety invariant: the largest displaced flat index of a valid f1
    # position stays inside [0, Spad) (lane padding is appended AFTER Sp), so
    # the circular roll never brings wrapped data into a valid product.
    assert (H - 1 + 2 * D) * Wp + (W - 1 + 2 * D) < Spad

    # --- generation-aware VMEM budgeting -------------------------------------
    try:
        vmem_phys = int(pltpu.get_tpu_info().vmem_capacity_bytes)
    except Exception:
        vmem_phys = 0
    if vmem_phys <= 0:
        vmem_phys = 64 * 1024 * 1024          # conservative fallback (v7x TC)
    budget = int(vmem_phys * 0.45)            # footprint target for the chunker
    vmem_limit = int(vmem_phys * 0.75)        # explicit scoped-VMEM limit

    # --- bf16 roll/multiply path only where the VPU supports bf16 ------------
    try:
        kind = jax.devices()[0].device_kind.lower()
    except Exception:
        kind = ""
    bf16_ok = ("v6" in kind) or ("v7" in kind)
    if feature1.dtype == jnp.bfloat16 and bf16_ok:
        compute_dtype = jnp.bfloat16
    else:
        compute_dtype = jnp.float32
    in_itemsize = jnp.dtype(feature1.dtype).itemsize

    n_c, Ct = _pick_c_chunk(C, Spad, P2pad, in_itemsize, budget)
    Cpad = n_c * Ct

    # Lane-dense layout plumbing: embed f1 at flat position y*Wp + x and f2 at
    # (y + D)*Wp + (x + D) of a flattened (Hp, Wp) grid, padded to Spad lanes.
    # With this embedding every displacement is a pure lane shift (no masking:
    # f1's zero padding kills all wrapped / out-of-bounds products).  Channels
    # C..Cpad-1 are zero and contribute nothing to either accumulated sum.
    f1e = jnp.pad(feature1, ((0, 0), (0, Cpad - C), (0, 0), (0, Wp - W)))
    f1e = jnp.pad(f1e.reshape(B, Cpad, H * Wp),
                  ((0, 0), (0, 0), (0, Spad - H * Wp)))
    f2e = jnp.pad(feature2, ((0, 0), (0, Cpad - C), (D, D), (D, D)))
    f2e = jnp.pad(f2e.reshape(B, Cpad, Sp), ((0, 0), (0, 0), (0, Spad - Sp)))
    # TODO(synk): the host-side embedding and the final strip each cost one
    # extra HBM pass; move them in-kernel (zeroed VMEM tile + strided DMA /
    # consumer reading the padded layout) if profiling shows them hot.

    kernel = functools.partial(_matching_kernel, patch=patch, dil=dil, wp=Wp,
                               spad=Spad, p2=P2, p2pad=P2pad,
                               compute_dtype=compute_dtype)

    corr = pl.pallas_call(
        kernel,
        out_shape=jax.ShapeDtypeStruct((B, P2pad, Spad), jnp.float32),
        grid_spec=pltpu.PrefetchScalarGridSpec(
            num_scalar_prefetch=0,
            grid=(B, n_c),                          # reduction (C) axis last
            in_specs=[
                pl.BlockSpec((1, Ct, Spad), lambda b, c: (b, c, 0)),
                pl.BlockSpec((1, Ct, Spad), lambda b, c: (b, c, 0)),
            ],
            out_specs=pl.BlockSpec((1, P2pad, Spad), lambda b, c: (b, 0, 0)),
            scratch_shapes=[
                pltpu.VMEM((1, Spad), jnp.float32),    # sum_c f1^2
                pltpu.VMEM((1, Spad), jnp.float32),    # sum_c f2^2
            ],
        ),
        compiler_params=pltpu.CompilerParams(
            dimension_semantics=("parallel", "arbitrary"),
            vmem_limit_bytes=vmem_limit),
    )(f1e, f2e)
    # TODO(synk): for B==1 on v7x a lane-blocked spatial "parallel" grid axis
    # (with +max_off halo lanes on the f2 block) would keep both TCs busy.

    # Strip padding: displacement rows P2..P2pad-1 and invalid flat positions.
    out = corr[:, :P2, :H * Wp].reshape(B, P2, H, Wp)[:, :, :, :W]
    return out.reshape(B, P2, H * W)


def _reference(feature1, feature2, *, patch, patch_dilation=1):
    """Pure-JAX reference (direct translation of the PyTorch module)."""
    eps = 1e-6

    def l2n(x):
        return x / jnp.sqrt(jnp.sum(x * x, axis=1, keepdims=True) + eps)

    f1 = l2n(feature1.astype(jnp.float32))
    f2 = l2n(feature2.astype(jnp.float32))
    B, C, H, W = f1.shape
    D = (patch // 2) * patch_dilation
    f2p = jnp.pad(f2, ((0, 0), (0, 0), (D, D), (D, D)))
    outs = []
    for pi in range(patch):
        for pj in range(patch):
            di, dj = pi * patch_dilation, pj * patch_dilation
            win = f2p[:, :, di:di + H, dj:dj + W]
            outs.append(jnp.sum(f1 * win, axis=1))              # (B, H, W)
    corr = jnp.stack(outs, axis=1)                              # (B, P*P, H, W)
    return jnp.maximum(corr, 0.0).reshape(B, patch * patch, H * W)


if __name__ == "__main__":
    key = jax.random.PRNGKey(0)
    k1, k2 = jax.random.split(key)

    B, C, H, W = 2, 16, 14, 14
    feature1 = jax.random.normal(k1, (B, C, H, W), dtype=jnp.float32)
    feature2 = jax.random.normal(k2, (B, C, H, W), dtype=jnp.float32)

    for PATCH, DIL in ((3, 1), (5, 2)):
        out = matching_layer_scs(feature1, feature2, ks=1, patch=PATCH,
                                 stride=1, pad=0, patch_dilation=DIL)
        out = jax.block_until_ready(out)
        ref = _reference(feature1, feature2, patch=PATCH, patch_dilation=DIL)
        np.testing.assert_allclose(np.asarray(out), np.asarray(ref),
                                   rtol=1e-4, atol=1e-5)
        assert out.shape == (B, PATCH * PATCH, H * W)

    print("KERNEL_OK")
</pallas_src>

<mosaic_0001>
module attributes {stable_mosaic.version = 11 : i64} {
  func.func @_matching_kernel(%arg0: i32, %arg1: i32, %arg2: memref<1x16x256xf32, #tpu.memory_space<vmem>>, %arg3: memref<1x16x256xf32, #tpu.memory_space<vmem>>, %arg4: memref<1x16x256xf32, #tpu.memory_space<vmem>>, %arg5: memref<1x256xf32, #tpu.memory_space<vmem>>, %arg6: memref<1x256xf32, #tpu.memory_space<vmem>>) attributes {dimension_semantics = [#tpu.dimension_semantics<parallel>, #tpu.dimension_semantics<arbitrary>], iteration_bounds = array<i64: 2, 1>, scalar_prefetch = 0 : i64, scratch_operands = 2 : i64, tpu.core_type = #tpu.core_type<tc>, window_params = [{transform_indices = @transform_0, window_bounds = array<i64: 1, 16, 256>}, {transform_indices = @transform_1, window_bounds = array<i64: 1, 16, 256>}, {transform_indices = @transform_2, window_bounds = array<i64: 1, 16, 256>}]} {
    %c0_i32 = arith.constant 0 : i32
    %0 = arith.cmpi eq, %arg1, %c0_i32 : i32
    %1 = arith.extui %0 : i1 to i32
    %c0_i32_0 = arith.constant 0 : i32
    %2 = arith.cmpi ne, %1, %c0_i32_0 : i32
    scf.if %2 {
      %cst_37 = arith.constant 0.000000e+00 : f32
      %71 = vector.broadcast %cst_37 : f32 to vector<1x16x256xf32>
      %c0_38 = arith.constant 0 : index
      %c0_39 = arith.constant 0 : index
      %c0_40 = arith.constant 0 : index
      %72 = vector.load %arg4[%c0_38, %c0_39, %c0_40] : memref<1x16x256xf32, #tpu.memory_space<vmem>>, vector<1x16x256xf32>
      tpu.vector_store %arg4[%c0_38, %c0_39, %c0_40], %71 {strides = array<i32>} : memref<1x16x256xf32, #tpu.memory_space<vmem>>, vector<1x16x256xf32>,
      %cst_41 = arith.constant 0.000000e+00 : f32
      %73 = vector.broadcast %cst_41 : f32 to vector<1x256xf32>
      %c0_42 = arith.constant 0 : index
      %c0_43 = arith.constant 0 : index
      %74 = vector.load %arg5[%c0_42, %c0_43] : memref<1x256xf32, #tpu.memory_space<vmem>>, vector<1x256xf32>
      tpu.vector_store %arg5[%c0_42, %c0_43], %73 {strides = array<i32>} : memref<1x256xf32, #tpu.memory_space<vmem>>, vector<1x256xf32>,
      %cst_44 = arith.constant 0.000000e+00 : f32
      %75 = vector.broadcast %cst_44 : f32 to vector<1x256xf32>
      %c0_45 = arith.constant 0 : index
      %c0_46 = arith.constant 0 : index
      %76 = vector.load %arg6[%c0_45, %c0_46] : memref<1x256xf32, #tpu.memory_space<vmem>>, vector<1x256xf32>
      tpu.vector_store %arg6[%c0_45, %c0_46], %75 {strides = array<i32>} : memref<1x256xf32, #tpu.memory_space<vmem>>, vector<1x256xf32>,
    } else {
    }
    %c0 = arith.constant 0 : index
    %c0_1 = arith.constant 0 : index
    %c0_2 = arith.constant 0 : index
    %3 = vector.load %arg2[%c0, %c0_1, %c0_2] : memref<1x16x256xf32, #tpu.memory_space<vmem>>, vector<1x16x256xf32>
    %4 = vector.shape_cast %3 : vector<1x16x256xf32> to vector<16x256xf32>
    %c0_3 = arith.constant 0 : index
    %c0_4 = arith.constant 0 : index
    %c0_5 = arith.constant 0 : index
    %5 = vector.load %arg3[%c0_3, %c0_4, %c0_5] : memref<1x16x256xf32, #tpu.memory_space<vmem>>, vector<1x16x256xf32>
    %6 = vector.shape_cast %5 : vector<1x16x256xf32> to vector<16x256xf32>
    %c0_6 = arith.constant 0 : index
    %c0_7 = arith.constant 0 : index
    %7 = vector.load %arg5[%c0_6, %c0_7] : memref<1x256xf32, #tpu.memory_space<vmem>>, vector<1x256xf32>
    %8 = arith.mulf %4, %4 : vector<16x256xf32>
    %cst = arith.constant dense<0.000000e+00> : vector<256xf32>
    %9 = vector.multi_reduction <add>, %8, %cst [0] : vector<16x256xf32> to vector<256xf32>
    %10 = vector.shape_cast %9 : vector<256xf32> to vector<1x256xf32>
    %11 = arith.addf %7, %10 : vector<1x256xf32>
    %c0_8 = arith.constant 0 : index
    %c0_9 = arith.constant 0 : index
    %12 = vector.load %arg5[%c0_8, %c0_9] : memref<1x256xf32, #tpu.memory_space<vmem>>, vector<1x256xf32>
    tpu.vector_store %arg5[%c0_8, %c0_9], %11 {strides = array<i32>} : memref<1x256xf32, #tpu.memory_space<vmem>>, vector<1x256xf32>,
    %c0_10 = arith.constant 0 : index
    %c0_11 = arith.constant 0 : index
    %13 = vector.load %arg6[%c0_10, %c0_11] : memref<1x256xf32, #tpu.memory_space<vmem>>, vector<1x256xf32>
    %14 = arith.mulf %6, %6 : vector<16x256xf32>
    %cst_12 = arith.constant dense<0.000000e+00> : vector<256xf32>
    %15 = vector.multi_reduction <add>, %14, %cst_12 [0] : vector<16x256xf32> to vector<256xf32>
    %16 = vector.shape_cast %15 : vector<256xf32> to vector<1x256xf32>
    %17 = arith.addf %13, %16 : vector<1x256xf32>
    %c0_13 = arith.constant 0 : index
    %c0_14 = arith.constant 0 : index
    %18 = vector.load %arg6[%c0_13, %c0_14] : memref<1x256xf32, #tpu.memory_space<vmem>>, vector<1x256xf32>
    tpu.vector_store %arg6[%c0_13, %c0_14], %17 {strides = array<i32>} : memref<1x256xf32, #tpu.memory_space<vmem>>, vector<1x256xf32>,
    %19 = arith.mulf %4, %6 : vector<16x256xf32>
    %cst_15 = arith.constant dense<0.000000e+00> : vector<256xf32>
    %20 = vector.multi_reduction <add>, %19, %cst_15 [0] : vector<16x256xf32> to vector<256xf32>
    %21 = vector.shape_cast %20 : vector<256xf32> to vector<1x256xf32>
    %c255_i32 = arith.constant 255 : i32
    %22 = tpu.dynamic_rotate %6 by %c255_i32 dim 1 : vector<16x256xf32>, i32 -> vector<16x256xf32>
    %23 = arith.mulf %4, %22 : vector<16x256xf32>
    %cst_16 = arith.constant dense<0.000000e+00> : vector<256xf32>
    %24 = vector.multi_reduction <add>, %23, %cst_16 [0] : vector<16x256xf32> to vector<256xf32>
    %25 = vector.shape_cast %24 : vector<256xf32> to vector<1x256xf32>
    %c254_i32 = arith.constant 254 : i32
    %26 = tpu.dynamic_rotate %6 by %c254_i32 dim 1 : vector<16x256xf32>, i32 -> vector<16x256xf32>
    %27 = arith.mulf %4, %26 : vector<16x256xf32>
    %cst_17 = arith.constant dense<0.000000e+00> : vector<256xf32>
    %28 = vector.multi_reduction <add>, %27, %cst_17 [0] : vector<16x256xf32> to vector<256xf32>
    %29 = vector.shape_cast %28 : vector<256xf32> to vector<1x256xf32>
    %c240_i32 = arith.constant 240 : i32
    %30 = tpu.dynamic_rotate %6 by %c240_i32 dim 1 : vector<16x256xf32>, i32 -> vector<16x256xf32>
    %31 = arith.mulf %4, %30 : vector<16x256xf32>
    %cst_18 = arith.constant dense<0.000000e+00> : vector<256xf32>
    %32 = vector.multi_reduction <add>, %31, %cst_18 [0] : vector<16x256xf32> to vector<256xf32>
    %33 = vector.shape_cast %32 : vector<256xf32> to vector<1x256xf32>
    %c239_i32 = arith.constant 239 : i32
    %34 = tpu.dynamic_rotate %6 by %c239_i32 dim 1 : vector<16x256xf32>, i32 -> vector<16x256xf32>
    %35 = arith.mulf %4, %34 : vector<16x256xf32>
    %cst_19 = arith.constant dense<0.000000e+00> : vector<256xf32>
    %36 = vector.multi_reduction <add>, %35, %cst_19 [0] : vector<16x256xf32> to vector<256xf32>
    %37 = vector.shape_cast %36 : vector<256xf32> to vector<1x256xf32>
    %c238_i32 = arith.constant 238 : i32
    %38 = tpu.dynamic_rotate %6 by %c238_i32 dim 1 : vector<16x256xf32>, i32 -> vector<16x256xf32>
    %39 = arith.mulf %4, %38 : vector<16x256xf32>
    %cst_20 = arith.constant dense<0.000000e+00> : vector<256xf32>
    %40 = vector.multi_reduction <add>, %39, %cst_20 [0] : vector<16x256xf32> to vector<256xf32>
    %41 = vector.shape_cast %40 : vector<256xf32> to vector<1x256xf32>
    %c224_i32 = arith.constant 224 : i32
    %42 = tpu.dynamic_rotate %6 by %c224_i32 dim 1 : vector<16x256xf32>, i32 -> vector<16x256xf32>
    %43 = arith.mulf %4, %42 : vector<16x256xf32>
    %cst_21 = arith.constant dense<0.000000e+00> : vector<256xf32>
    %44 = vector.multi_reduction <add>, %43, %cst_21 [0] : vector<16x256xf32> to vector<256xf32>
    %45 = vector.shape_cast %44 : vector<256xf32> to vector<1x256xf32>
    %c223_i32 = arith.constant 223 : i32
    %46 = tpu.dynamic_rotate %6 by %c223_i32 dim 1 : vector<16x256xf32>, i32 -> vector<16x256xf32>
    %47 = arith.mulf %4, %46 : vector<16x256xf32>
    %cst_22 = arith.constant dense<0.000000e+00> : vector<256xf32>
    %48 = vector.multi_reduction <add>, %47, %cst_22 [0] : vector<16x256xf32> to vector<256xf32>
    %49 = vector.shape_cast %48 : vector<256xf32> to vector<1x256xf32>
    %c0_23 = arith.constant 0 : index
    %c0_24 = arith.constant 0 : index
    %c0_25 = arith.constant 0 : index
    %50 = vector.load %arg4[%c0_23, %c0_24, %c0_25] : memref<1x16x256xf32, #tpu.memory_space<vmem>>, vector<1x8x256xf32>
    %51 = vector.shape_cast %50 : vector<1x8x256xf32> to vector<8x256xf32>
    %52 = tpu.concatenate %21, %25, %29, %33, %37, %41, %45, %49 in 0 : vector<1x256xf32>, vector<1x256xf32>, vector<1x256xf32>, vector<1x256xf32>, vector<1x256xf32>, vector<1x256xf32>, vector<1x256xf32>, vector<1x256xf32> -> vector<8x256xf32>
    %53 = arith.addf %51, %52 : vector<8x256xf32>
    %c0_26 = arith.constant 0 : index
    %c0_27 = arith.constant 0 : index
    %c0_28 = arith.constant 0 : index
    %54 = vector.load %arg4[%c0_26, %c0_27, %c0_28] : memref<1x16x256xf32, #tpu.memory_space<vmem>>, vector<1x8x256xf32>
    %55 = vector.shape_cast %54 : vector<1x8x256xf32> to vector<8x256xf32>
    %56 = vector.shape_cast %53 : vector<8x256xf32> to vector<1x8x256xf32>
    tpu.vector_store %arg4[%c0_26, %c0_27, %c0_28], %56 {strides = array<i32>} : memref<1x16x256xf32, #tpu.memory_space<vmem>>, vector<1x8x256xf32>,
    %c222_i32 = arith.constant 222 : i32
    %57 = tpu.dynamic_rotate %6 by %c222_i32 dim 1 : vector<16x256xf32>, i32 -> vector<16x256xf32>
    %58 = arith.mulf %4, %57 : vector<16x256xf32>
    %cst_29 = arith.constant dense<0.000000e+00> : vector<256xf32>
    %59 = vector.multi_reduction <add>, %58, %cst_29 [0] : vector<16x256xf32> to vector<256xf32>
    %60 = vector.shape_cast %59 : vector<256xf32> to vector<1x256xf32>
    %c0_30 = arith.constant 0 : index
    %c8 = arith.constant 8 : index
    %c0_31 = arith.constant 0 : index
    %61 = vector.load %arg4[%c0_30, %c8, %c0_31] : memref<1x16x256xf32, #tpu.memory_space<vmem>>, vector<1x8x256xf32>
    %62 = vector.shape_cast %61 : vector<1x8x256xf32> to vector<8x256xf32>
    %63 = tpu.concatenate %60, %60, %60, %60, %60, %60, %60, %60 in 0 : vector<1x256xf32>, vector<1x256xf32>, vector<1x256xf32>, vector<1x256xf32>, vector<1x256xf32>, vector<1x256xf32>, vector<1x256xf32>, vector<1x256xf32> -> vector<8x256xf32>
    %64 = arith.addf %62, %63 : vector<8x256xf32>
    %c0_32 = arith.constant 0 : index
    %c8_33 = arith.constant 8 : index
    %c0_34 = arith.constant 0 : index
    %65 = vector.load %arg4[%c0_32, %c8_33, %c0_34] : memref<1x16x256xf32, #tpu.memory_space<vmem>>, vector<1x8x256xf32>
    %66 = vector.shape_cast %65 : vector<1x8x256xf32> to vector<8x256xf32>
    %67 = vector.shape_cast %64 : vector<8x256xf32> to vector<1x8x256xf32>
    tpu.vector_store %arg4[%c0_32, %c8_33, %c0_34], %67 {strides = array<i32>} : memref<1x16x256xf32, #tpu.memory_space<vmem>>, vector<1x8x256xf32>,
    %c0_i32_35 = arith.constant 0 : i32
    %68 = arith.cmpi eq, %arg1, %c0_i32_35 : i32
    %69 = arith.extui %68 : i1 to i32
    %c0_i32_36 = arith.constant 0 : i32
    %70 = arith.cmpi ne, %69, %c0_i32_36 : i32
    scf.if %70 {
      %c0_37 = arith.constant 0 : index
      %c0_38 = arith.constant 0 : index
      %71 = vector.load %arg5[%c0_37, %c0_38] : memref<1x256xf32, #tpu.memory_space<vmem>>, vector<1x256xf32>
      %cst_39 = arith.constant 9.99999997E-7 : f32
      %72 = vector.broadcast %cst_39 : f32 to vector<1x256xf32>
      %73 = arith.addf %71, %72 : vector<1x256xf32>
      %74 = math.rsqrt %73 : vector<1x256xf32>
      %cst_40 = arith.constant 5.000000e-01 : f32
      %75 = vector.broadcast %cst_40 : f32 to vector<1x256xf32>
      %76 = arith.mulf %75, %73 : vector<1x256xf32>
      %77 = arith.mulf %76, %74 : vector<1x256xf32>
      %78 = arith.mulf %77, %74 : vector<1x256xf32>
      %cst_41 = arith.constant 1.500000e+00 : f32
      %79 = vector.broadcast %cst_41 : f32 to vector<1x256xf32>
      %80 = arith.subf %79, %78 : vector<1x256xf32>
      %81 = arith.mulf %74, %80 : vector<1x256xf32>
      %c0_42 = arith.constant 0 : index
      %c0_43 = arith.constant 0 : index
      %82 = vector.load %arg6[%c0_42, %c0_43] : memref<1x256xf32, #tpu.memory_space<vmem>>, vector<1x256xf32>
      %cst_44 = arith.constant 9.99999997E-7 : f32
      %83 = vector.broadcast %cst_44 : f32 to vector<1x256xf32>
      %84 = arith.addf %82, %83 : vector<1x256xf32>
      %85 = math.rsqrt %84 : vector<1x256xf32>
      %cst_45 = arith.constant 5.000000e-01 : f32
      %86 = vector.broadcast %cst_45 : f32 to vector<1x256xf32>
      %87 = arith.mulf %86, %84 : vector<1x256xf32>
      %88 = arith.mulf %87, %85 : vector<1x256xf32>
      %89 = arith.mulf %88, %85 : vector<1x256xf32>
      %cst_46 = arith.constant 1.500000e+00 : f32
      %90 = vector.broadcast %cst_46 : f32 to vector<1x256xf32>
      %91 = arith.subf %90, %89 : vector<1x256xf32>
      %92 = arith.mulf %85, %91 : vector<1x256xf32>
      %c255_i32_47 = arith.constant 255 : i32
      %93 = tpu.dynamic_rotate %92 by %c255_i32_47 dim 1 : vector<1x256xf32>, i32 -> vector<1x256xf32>
      %c254_i32_48 = arith.constant 254 : i32
      %94 = tpu.dynamic_rotate %92 by %c254_i32_48 dim 1 : vector<1x256xf32>, i32 -> vector<1x256xf32>
      %c240_i32_49 = arith.constant 240 : i32
      %95 = tpu.dynamic_rotate %92 by %c240_i32_49 dim 1 : vector<1x256xf32>, i32 -> vector<1x256xf32>
      %c239_i32_50 = arith.constant 239 : i32
      %96 = tpu.dynamic_rotate %92 by %c239_i32_50 dim 1 : vector<1x256xf32>, i32 -> vector<1x256xf32>
      %c238_i32_51 = arith.constant 238 : i32
      %97 = tpu.dynamic_rotate %92 by %c238_i32_51 dim 1 : vector<1x256xf32>, i32 -> vector<1x256xf32>
      %c224_i32_52 = arith.constant 224 : i32
      %98 = tpu.dynamic_rotate %92 by %c224_i32_52 dim 1 : vector<1x256xf32>, i32 -> vector<1x256xf32>
      %c223_i32_53 = arith.constant 223 : i32
      %99 = tpu.dynamic_rotate %92 by %c223_i32_53 dim 1 : vector<1x256xf32>, i32 -> vector<1x256xf32>
      %c222_i32_54 = arith.constant 222 : i32
      %100 = tpu.dynamic_rotate %92 by %c222_i32_54 dim 1 : vector<1x256xf32>, i32 -> vector<1x256xf32>
      %101 = tpu.concatenate %92, %93, %94, %95, %96, %97, %98, %99, %100, %100, %100, %100, %100, %100, %100, %100 in 0 : vector<1x256xf32>, vector<1x256xf32>, vector<1x256xf32>, vector<1x256xf32>, vector<1x256xf32>, vector<1x256xf32>, vector<1x256xf32>, vector<1x256xf32>, vector<1x256xf32>, vector<1x256xf32>, vector<1x256xf32>, vector<1x256xf32>, vector<1x256xf32>, vector<1x256xf32>, vector<1x256xf32>, vector<1x256xf32> -> vector<16x256xf32>
      %c0_55 = arith.constant 0 : index
      %c0_56 = arith.constant 0 : index
      %c0_57 = arith.constant 0 : index
      %102 = vector.load %arg4[%c0_55, %c0_56, %c0_57] : memref<1x16x256xf32, #tpu.memory_space<vmem>>, vector<1x16x256xf32>
      %103 = vector.shape_cast %102 : vector<1x16x256xf32> to vector<16x256xf32>
      %104 = vector.broadcast %81 : vector<1x256xf32> to vector<16x256xf32>
      %105 = arith.mulf %104, %101 : vector<16x256xf32>
      %106 = arith.mulf %103, %105 : vector<16x256xf32>
      %cst_58 = arith.constant 0.000000e+00 : f32
      %107 = vector.broadcast %cst_58 : f32 to vector<16x256xf32>
      %108 = arith.maximumf %106, %107 : vector<16x256xf32>
      %c0_59 = arith.constant 0 : index
      %c0_60 = arith.constant 0 : index
      %c0_61 = arith.constant 0 : index
      %109 = vector.load %arg4[%c0_59, %c0_60, %c0_61] : memref<1x16x256xf32, #tpu.memory_space<vmem>>, vector<1x16x256xf32>
      %110 = vector.shape_cast %109 : vector<1x16x256xf32> to vector<16x256xf32>
      %111 = vector.shape_cast %108 : vector<16x256xf32> to vector<1x16x256xf32>
      tpu.vector_store %arg4[%c0_59, %c0_60, %c0_61], %111 {strides = array<i32>} : memref<1x16x256xf32, #tpu.memory_space<vmem>>, vector<1x16x256xf32>,
    } else {
    }
    return
  }
  func.func @transform_0(%arg0: i32, %arg1: i32) -> (i32, i32, i32) {
    %c0_i32 = arith.constant 0 : i32
    %c0_i32_0 = arith.constant 0 : i32
    return %arg0, %arg1, %c0_i32 : i32, i32, i32
  }
  func.func @transform_1(%arg0: i32, %arg1: i32) -> (i32, i32, i32) {
    %c0_i32 = arith.constant 0 : i32
    %c0_i32_0 = arith.constant 0 : i32
    return %arg0, %arg1, %c0_i32 : i32, i32, i32
  }
  func.func @transform_2(%arg0: i32, %arg1: i32) -> (i32, i32, i32) {
    %c0_i32 = arith.constant 0 : i32
    %c0_i32_0 = arith.constant 0 : i32
    %c0_i32_1 = arith.constant 0 : i32
    return %arg0, %c0_i32, %c0_i32_0 : i32, i32, i32
  }
}

</mosaic_0001>

<bundles_post_ra>
// kernel: tpu_custom_call.1
= control target key start
LH: loop header
LB: loop body
LE: loop exit
PB: predicated region body
PF: predicated region fallthrough
CT: control target
= control target key end

     0   :  { %7 = vsyncpa [#allocation5], 0  ;;  %s1795_s0 = inlined_call_operand.hbm [shape: f32[2,16,256], index: 0, kind: input, shape index: {}]   ;;  %s1796_s1 = inlined_call_operand.hbm [shape: f32[2,16,256], index: 1, kind: input, shape index: {}]   ;;  %s1797_s2 = inlined_call_operand.hbm [shape: f32[2,16,256], index: 2, kind: output, shape index: {}]  }
   0x1   :  { %9 = vsyncpa [#allocation5 + $0x1], 0 }
   0x2   :  { %10 = vsyncpa [#allocation8], 0 }
   0x3   :  { %12 = vsyncpa [#allocation8 + $0x1], 0 }
   0x4   :  { %13 = vsyncpa [#allocation6], 0 }
   0x5   :  { %15 = vsyncpa [#allocation6 + $0x1], 0  ;;  %s1232_s9 = smov 0   ;;  %s1234_s10 = smov 0  }
   0x6   :  { %s1236_s11 = smov 0   ;;  %s1238_s12 = smov 0  }
   0x7   :  { %s1240_s13 = smov 0   ;;  %s1242_s14 = smov 0  }
   0x8 LB: > { %s950_s15 = sadd.s32 4294967295, %s1202_s14   ;;  %s951_s16 = sadd.s32 4294967294, %s1202_s14   ;;  %s1202_s14 = sphi %s1242_s14, %s21_s14   ;;  %s1198_s13 = sphi %s1240_s13, %s1809_s13   ;;  %s1194_s12 = sphi %s1238_s12, %s1808_s12   ;;  %s1190_s11 = sphi %s1236_s11, %s1807_s11   ;;  %s1186_s10 = sphi %s1234_s10, %s1806_s10   ;;  %s1182_s9 = sphi %s1232_s9, %s1805_s9  }
   0x9   : > { %s33_s17 = sadd.s32 1, %s1198_s13  ;;  %s42_s18 = sadd.s32 1, %s1190_s11 }
   0xa   : > { %p35_p0 = scmp.ge.s32.totalorder %s33_s17, 2  ;;  %p49_p1 = scmp.ne.s32.totalorder %s1190_s11, %s1186_s10 }
   0xb   : > { %p50_p2 = scmp.eq.s32.totalorder %s1202_s14, 0  ;;  %p55_p3 = scmp.ne.s32.totalorder %s1186_s10, %s1182_s9 }
   0xc   : > { %s1811_s17 = smov (%p35_p0, %s33_s17), 0  ;;  %p56_p5 = scmp.eq.s32.totalorder %s950_s15, 0 }
   0xd   : > { %p1273_p4 = por %p50_p2, %p49_p1  ;;  %s37_s20 = ssub.s32 %s1198_s13, %s1811_s17 }
   0xe   : > { %p107_p6 = scmp.eq.s32.totalorder %s950_s15, 1  ;;  %p40_p7 = scmp.eq.s32.totalorder %s37_s20, 0 }
   0xf   : > { %p1279_p8 = por %p56_p5, %p55_p3  ;;  %p113_p10 = scmp.eq.s32.totalorder %s951_s16, 1 }
  0x10   : > { %p1283_p9 = por %p107_p6, %p49_p1  ;;  %p953_p12 = scmp.ge.s32.totalorder %s1202_s14, 2 }
  0x11   : > { %s1288_s23 = scalar_select %p40_p7, %s1190_s11, %s42_s18  }
  0x12   : > { %p1290_p11 = por %p113_p10, %p55_p3  ;;  %p989_p13 = scmp.lt.s32.totalorder %s1202_s14, 2 }
  0x13   : > { %s1297_s25 = sand.u32 1, %s1190_s11   ;;  %s969_s27 = sshll.u32 %s1198_s13, 5 }
  0x14   : > { %s954_s26 = sshll.u32 %s1297_s25, 5  ;;  %s145_s30 = scalar_lea.hbm %s1795_s0, %s969_s27 }
  0x15   : > { %s137_s3 = scalar_lea.vmem [#allocation4], %s954_s26  ;;  %s146_s5 = sshll.u32 %s145_s30, 4  ;;  %s147_s5 = int_to_ptr.hbm [resolvable:$true] %s146_s5 }
  0x16   : > { %s148_s4 = sshll.u32 %s137_s3, 4  ;;  %p1306_p0 = pnand %p989_p13, %p1273_p4  ;;  %s149_s4 = int_to_ptr.vmem [resolvable:$true] %s148_s4 }
  0x17   : > { %p960_p1 = scmp.ge.s32.totalorder %s1202_s14, 1  ;;  %s134_s7 = scalar_lea.sflag [#allocation5], %s1297_s25 }
  0x18   : > { %s1204_s8 = smov 256   ;;  %s1205_s15 = smov 16  }
  0x19   : > { %981 = dma.hbm_to_vmem [thread:$0]  (!%p1306_p0), %s147_s5, 512, %s149_s4, %s134_s7, %s1204_s8, %s1204_s8, %s1205_s15  }
  0x1a   : > { %p181_p2 = scmp.lt.s32.totalorder %s1202_s14, 3  ;;  %s170_s20 = scalar_lea.hbm %s1796_s1, %s969_s27 }
  0x1b   : > { %s171_s28 = sshll.u32 %s170_s20, 4  ;;  %s162_s19 = scalar_lea.vmem [#allocation7], %s954_s26  ;;  %s172_s28 = int_to_ptr.hbm [resolvable:$true] %s171_s28 }
  0x1c   : > { %p182_p3 = pnand %p960_p1, %p181_p2  ;;  %s173_s29 = sshll.u32 %s162_s19, 4  ;;  %s174_s29 = int_to_ptr.vmem [resolvable:$true] %s173_s29 }
  0x1d   : > { %s159_s30 = scalar_lea.sflag [#allocation8], %s1297_s25  ;;  %s1322_s3 = sand.u32 (!%p182_p3), 1, %s1186_s10  }
  0x1e   : > { %984 = dma.hbm_to_vmem [thread:$0]  (!%p1306_p0), %s172_s28, 512, %s174_s29, %s159_s30, %s1204_s8, %s1204_s8, %s1205_s15  }
  0x1f   : > { %185 = sbr.rel (%p182_p3) target bundleno = 291 (0x123), region = 28  ;;  %s1325_s4 = sshll.u32 (!%p182_p3), %s1322_s3, 5 }
  0x20   : > { %s188_s27 = scalar_lea.sflag (!%p182_p3), [#allocation5], %s1322_s3  ;;  %s1329_s5 = scalar_lea.vmem (!%p182_p3), [#allocation4], %s1325_s4 }
  0x24   : > { %1169 = dma.done.wait (%p1279_p8), %s188_s27, 512  }
  0x25   : > { %1171 = vsyncadd (%p1279_p8), %s188_s27, 4294966784  ;;  %s198_s25 = scalar_lea.sflag [#allocation8], %s1322_s3  ;;  %s201_s26 = scalar_lea.vmem [#allocation7], %s1325_s4 }
  0x26   : > { %1173 = dma.done.wait (%p1279_p8), %s198_s25, 512  }
  0x27   : > { %1175 = vsyncadd (%p1279_p8), %s198_s25, 4294966784  ;;  %v238_v0 = vlaneseq  ;;  %v1206_v2 = vmov 0.0   ;;  %v1350_v3 = vld [vmem:[%s201_s26 + $0x8] sm:$0xff]  ;;  %v1352_v4 = vld [vmem:[%s201_s26] sm:$0xff]  ;;  %s1207_s21 = smov 127   ;;  %s1208_s6 = smov 126  }
  0x28   : > { %v1354_v5 = vld [vmem:[%s201_s26 + $0x18] sm:$0xff]  ;;  %331 = vrot.lane.b32.xlu1 %v1350_v3, %s1207_s21  ;;  %v285_v6 = vmul.f32 %v1350_v3, %v1350_v3  ;;  %327 = vrot.lane.b32.xlu0 %v1352_v4, %s1207_s21  ;;  %v284_v7 = vmul.f32 %v1352_v4, %v1352_v4  ;;  %v1366_v9 = vld [vmem:[%s201_s26 + $0x10] sm:$0xff]  ;;  %vm274_vm1 = vcmask 1040384   ;;  %s1209_s7 = smov 112   ;;  %s1210_s8 = smov 111   ;;  %vm550_vm9 = vcmask 1041408  }
  0x29   : > { %vm1342_vm0 = vcmp.lt.s32.totalorder %v238_v0, 256  ;;  %v287_v8 = vmul.f32 %v1354_v5, %v1354_v5  ;;  %v286_v10 = vmul.f32 %v1366_v9, %v1366_v9  ;;  %360 = vrot.lane.b32.xlu2 %v1352_v4, %s1208_s6  ;;  %s1211_s15 = smov 110   ;;  %s1212_s16 = smov 96   ;;  %v1458_v48 = vand.u32 127, %v238_v0  ;;  %v1461_v49 = vld [vmem:[%s1329_s5] sm:$0xff]  ;;  %v1464_v50 = vld [vmem:[%s1329_s5 + $0x8] sm:$0xff] }
  0x2a   : > { %243 = vst.msk [vmem:[#allocation3] sm:$0x3] %vm1342_vm0, %v1206_v2  ;;  %s1213_s18 = smov 95   ;;  %s1214_s20 = smov 94   ;;  %v1467_v51 = vld [vmem:[%s1329_s5 + $0x10] sm:$0xff]  ;;  %v1470_v52 = vld [vmem:[%s1329_s5 + $0x18] sm:$0xff]  ;;  %v253_v53 = vmul.f32 %v1461_v49, %v1461_v49  ;;  %v254_v54 = vmul.f32 %v1464_v50, %v1464_v50  ;;  %v309_v57 = vmul.f32 %v1352_v4, %v1461_v49  ;;  %v310_v58 = vmul.f32 %v1350_v3, %v1464_v50 }
  0x2b   : > { %242 = vst.msk [vmem:[#allocation2] sm:$0x3] %vm1342_vm0, %v1206_v2  ;;  %v295_v11 = vadd.f32 %v287_v8, %v285_v6  ;;  %v288_v12 = vadd.f32 %v286_v10, %v284_v7  ;;  %v255_v55 = vmul.f32 %v1467_v51, %v1467_v51  ;;  %v256_v56 = vmul.f32 %v1470_v52, %v1470_v52  ;;  %s1712_s28 = scalar_lea.vmem [#allocation9], %s1325_s4  ;;  %s971_s19 = sshll.u32 %s1194_s12, 5 }
  0x2c   : > { %vm337_vm5 = vcmp.lt.s32.totalorder %v1458_v48, 127  ;;  %v311_v59 = vmul.f32 %v1366_v9, %v1467_v51  ;;  %v312_v60 = vmul.f32 %v1354_v5, %v1470_v52  ;;  %vm368_vm6 = vcmp.lt.s32.totalorder %v1458_v48, 126  ;;  %s836_s30 = scalar_lea.hbm %s1797_s2, %s971_s19  ;;  %s837_s4 = sshll.u32 %s1712_s28, 4  ;;  %s838_s4 = int_to_ptr.vmem [resolvable:$true] %s837_s4 }
  0x2d   : > { %v296_v13 = vrot.slane %v295_v11, 4  ;;  %v289_v14 = vrot.slane %v288_v12, 4  ;;  %v257_v63 = vadd.f32 %v255_v55, %v253_v53  ;;  %v264_v0 = vadd.f32 %v256_v56, %v254_v54  ;;  %s839_s27 = sshll.u32 %s836_s30, 4  ;;  %s825_s5 = scalar_lea.sflag [#allocation6], %s1322_s3  ;;  %s840_s27 = int_to_ptr.hbm [resolvable:$true] %s839_s27 }
  0x2e   : > { %v313_v6 = vadd.f32 %v311_v59, %v309_v57  ;;  %v320_v7 = vadd.f32 %v312_v60, %v310_v58  ;;  %vm399_vm7 = vcmp.lt.s32.totalorder %v1458_v48, 112  ;;  %vm430_vm8 = vcmp.lt.s32.totalorder %v1458_v48, 111  ;;  %s1130_s25 = sshra.s32 %s840_s27, 4  ;;  %s1131_s25 = int_to_ptr.hbm [resolvable:$true] %s1130_s25 }
  0x2f   : > { %v297_v15 = vadd.f32 %v296_v13, %v295_v11  ;;  %v290_v16 = vadd.f32 %v289_v14, %v288_v12  ;;  %v258_v8 = vrot.slane %v257_v63, 4  ;;  %vm553_vm10 = vcmask 1042432   ;;  %s1132_s26 = scalar_lea.hbm %s1131_s25, 32  ;;  %p1137_p7 = scmp.lt.s32.totalorder %s1131_s25, %s1797_s2 }
  0x30   : > { %333 = vrot.lane.b32.xlu1 %v1354_v5, %s1207_s21  ;;  %329 = vrot.lane.b32.xlu0 %v1366_v9, %s1207_s21  ;;  %v321_v10 = vrot.slane %v320_v7, 4  ;;  %vm461_vm11 = vcmp.lt.s32.totalorder %v1458_v48, 110  ;;  %vm556_vm12 = vcmask 1043456   ;;  %vm559_vm13 = vcmask 1044480   ;;  %p1133_p4 = scmp.ne.s32.totalorder %s1131_s25, %s1132_s26 }
  0x31   : > { %v298_v17 = vrot.slane %v297_v15, 2  ;;  %v291_v18 = vrot.slane %v290_v16, 2  ;;  %362 = vrot.lane.b32.xlu2 %v1366_v9, %s1208_s6  ;;  %v283_v26 = vld [vmem:[#allocation3] sm:$0x3]  ;;  %v259_v13 = vadd.f32 %v258_v8, %v257_v63  ;;  %vm492_vm14 = vcmp.lt.s32.totalorder %v1458_v48, 96 }
  0x32   : > { %p1134_p5 = pnand %p1133_p4, %p1283_p9 }
  0x33   : > { %v299_v19 = vadd.f32 %v298_v17, %v297_v15  ;;  %v292_v20 = vadd.f32 %v291_v18, %v290_v16 }
  0x34   : > { %p1135_p6 = pneg %p1134_p5 }
  0x35   : > { %v300_v21 = vrot.slane %v299_v19, 1  ;;  %v293_v22 = vrot.slane %v292_v20, 1 }
  0x37   : > { %v301_v23 = vadd.f32 %v300_v21, %v299_v19  ;;  %v294_v24 = vadd.f32 %v293_v22, %v292_v20 }
  0x38   : > { %366 = vrot.lane.b32.xlu1 %v1354_v5, %s1208_s6  ;;  %364 = vrot.lane.b32.xlu0 %v1350_v3, %s1208_s6 }
  0x39   : > { %v304_v25 = vrot.slane %v301_v23, 7  ;;  %391 = vrot.lane.b32.xlu2 %v1352_v4, %s1209_s7  ;;  %v322_v23 = vadd.f32 %v321_v10, %v320_v7 }
  0x3b   : > { %v305_v27 = vsel %vm274_vm1, %v294_v24, %v304_v25  ;;  %v260_v24 = vrot.slane %v259_v13, 2 }
  0x3c   : > { %v307_v28 = vadd.f32 %v305_v27, %v283_v26 }
  0x3e   : > { %308 = vst.msk [vmem:[#allocation3] sm:$0x3] %vm1342_vm0, %v307_v28 }
  0x40   : > { %395 = vrot.lane.b32.xlu1 %v1350_v3, %s1209_s7  ;;  %393 = vrot.lane.b32.xlu0 %v1366_v9, %s1209_s7 }
  0x41   : > { %397 = vrot.lane.b32.xlu2 %v1354_v5, %s1209_s7 }
  0x45   : > { %v629_v29 = vld [vmem:[#allocation3] sm:$0x3] }
  0x46   : > { %v630_v30 = vadd.f32 1e-06, %v629_v29 }
  0x48   : > { %1052 = vrsqrt.f32 %v630_v30  ;;  %424 = vrot.lane.b32.xlu1 %v1366_v9, %s1210_s8  ;;  %422 = vrot.lane.b32.xlu0 %v1352_v4, %s1210_s8  ;;  %vm637_vm2 = vweird.f32 %v630_v30  ;;  %v641_v37 = vmul.f32 0.5, %v630_v30 }
  0x49   : > { %426 = vrot.lane.b32.xlu2 %v1350_v3, %s1210_s8 }
  0x4e   : > { %v1053_v31 = vpop.eup %1052 }
  0x4f   : > { %v632_v32 = vmul.f32 %v1053_v31, %v630_v30  ;;  %vm638_vm3 = vweird.f32 %v1053_v31 }
  0x50   : > { %453 = vrot.lane.b32.xlu1 %v1352_v4, %s1211_s15  ;;  %428 = vrot.lane.b32.xlu0 %v1354_v5, %s1210_s8  ;;  %vm639_vm4 = vmor %vm637_vm2, %vm638_vm3  ;;  %vm580_vm3 = vcmp.lt.s32.totalorder %v1458_v48, 94 }
  0x51   : > { %455 = vrot.lane.b32.xlu2 %v1366_v9, %s1211_s15  ;;  %v633_v33 = vmul.f32 %v1053_v31, %v632_v32  ;;  %v261_v32 = vadd.f32 %v260_v24, %v259_v13 }
  0x53   : > { %v634_v34 = vmul.f32 0.5, %v633_v33  ;;  %v262_v58 = vrot.slane %v261_v32, 1 }
  0x55   : > { %v635_v35 = vsub.f32 1.5, %v634_v34 }
  0x57   : > { %v636_v36 = vmul.f32 %v1053_v31, %v635_v35 }
  0x58   : > { %459 = vrot.lane.b32.xlu1 %v1354_v5, %s1211_s15  ;;  %457 = vrot.lane.b32.xlu0 %v1350_v3, %s1211_s15 }
  0x59   : > { %484 = vrot.lane.b32.xlu2 %v1352_v4, %s1212_s16  ;;  %v640_v38 = vsel %vm639_vm4, %v1053_v31, %v636_v36  ;;  %v323_v31 = vrot.slane %v322_v23, 2  ;;  %vm523_vm4 = vcmp.lt.s32.totalorder %v1458_v48, 95 }
  0x5a   : > { %v642_v39 = vmul.f32 %v641_v37, %v640_v38 }
  0x5c   : > { %v643_v40 = vmul.f32 %v642_v39, %v640_v38 }
  0x5e   : > { %v644_v41 = vsub.f32 1.5, %v643_v40 }
  0x60   : > { %488 = vrot.lane.b32.xlu1 %v1350_v3, %s1212_s16  ;;  %486 = vrot.lane.b32.xlu0 %v1366_v9, %s1212_s16  ;;  %v645_v42 = vmul.f32 %v644_v41, %v640_v38 }
  0x61   : > { %490 = vrot.lane.b32.xlu2 %v1354_v5, %s1212_s16 }
  0x62   : > { %v1427_v43 = vperm.slane %v645_v42, 0  ;;  %v1433_v44 = vperm.slane %v645_v42, 1 }
  0x68   : > { %517 = vrot.lane.b32.xlu1 %v1366_v9, %s1213_s18  ;;  %515 = vrot.lane.b32.xlu0 %v1352_v4, %s1213_s18 }
  0x69   : > { %519 = vrot.lane.b32.xlu2 %v1350_v3, %s1213_s18 }
  0x70   : > { %572 = vrot.lane.b32.xlu1 %v1352_v4, %s1214_s20  ;;  %521 = vrot.lane.b32.xlu0 %v1354_v5, %s1213_s18 }
  0x71   : > { %574 = vrot.lane.b32.xlu2 %v1366_v9, %s1214_s20  ;;  %v265_v9 = vrot.slane %v264_v0, 4 }
  0x73   : > { %v266_v14 = vadd.f32 %v265_v9, %v264_v0 }
  0x75   : > { %v267_v25 = vrot.slane %v266_v14, 2 }
  0x77   : > { %v268_v33 = vadd.f32 %v267_v25, %v266_v14 }
  0x78   : > { %578 = vrot.lane.b32.xlu1 %v1354_v5, %s1214_s20  ;;  %576 = vrot.lane.b32.xlu0 %v1350_v3, %s1214_s20  ;;  %v314_v5 = vrot.slane %v313_v6, 4 }
  0x79   : > { %651 = vrot.lane.b32.xlu2 %v1427_v43, %s1207_s21  ;;  %v269_v59 = vrot.slane %v268_v33, 1 }
  0x7a   : > { %v315_v22 = vadd.f32 %v314_v5, %v313_v6  ;;  %v263_v6 = vadd.f32 %v262_v58, %v261_v32 }
  0x7b   : > { %v270_v7 = vadd.f32 %v269_v59, %v268_v33 }
  0x7c   : > { %v316_v30 = vrot.slane %v315_v22, 2 }
  0x7d   : > { %v273_v25 = vrot.slane %v270_v7, 7 }
  0x7e   : > { %v317_v60 = vadd.f32 %v316_v30, %v315_v22 }
  0x80   : > { %653 = vrot.lane.b32.xlu0 %v1433_v44, %s1207_s21  ;;  %693 = vrot.lane.b32.xlu1 %v1427_v43, %s1214_s20  ;;  %v318_v8 = vrot.slane %v317_v60, 1 }
  0x81   : > { %695 = vrot.lane.b32.xlu2 %v1433_v44, %s1214_s20 }
  0x83   : > { %v1439_v45 = vpop.permute.xlu2 %360 }
  0x88   : > { %657 = vrot.lane.b32.xlu0 %v1427_v43, %s1208_s6  ;;  %659 = vrot.lane.b32.xlu1 %v1433_v44, %s1208_s6 }
  0x89   : > { %663 = vrot.lane.b32.xlu2 %v1427_v43, %s1209_s7 }
  0x8b   : > { %v1447_v46 = vpop.permute.xlu2 %362 }
  0x90   : > { %665 = vrot.lane.b32.xlu0 %v1433_v44, %s1209_s7  ;;  %669 = vrot.lane.b32.xlu1 %v1427_v43, %s1210_s8  ;;  %s1136_s7 = scalar_lea.hbm %s1797_s2, 64 }
  0x91   : > { %671 = vrot.lane.b32.xlu2 %v1433_v44, %s1210_s8  ;;  %p1138_p8 = scmp.lt.s32.totalorder %s1136_s7, %s1132_s26 }
  0x93   : > { %v1455_v47 = vpop.permute.xlu2 %391  ;;  %p1139_p10 = por %p1138_p8, %p1137_p7 }
  0x95   : > { %p1140_p13 = pnand %p1139_p10, %p1135_p6 }
  0x98   : > { %675 = vrot.lane.b32.xlu0 %v1427_v43, %s1211_s15  ;;  %677 = vrot.lane.b32.xlu1 %v1433_v44, %s1211_s15 }
  0x99   : > { %681 = vrot.lane.b32.xlu2 %v1427_v43, %s1212_s16 }
  0x9a   : > { %v332_v61 = vpop.permute.xlu1 %331  ;;  %v328_v62 = vpop.permute.xlu0 %327 }
  0x9b   : > { %v338_v2 = vsel %vm337_vm5, %v328_v62, %v332_v61  ;;  %v340_v4 = vsel %vm337_vm5, %v332_v61, %v328_v62  ;;  %v1499_v3 = vpop.permute.xlu2 %397  ;;  %v324_v61 = vadd.f32 %v323_v31, %v322_v23 }
  0x9c   : > { %v342_v18 = vmul.f32 %v338_v2, %v1461_v49  ;;  %v343_v19 = vmul.f32 %v340_v4, %v1464_v50 }
  0x9d   : > { %v325_v9 = vrot.slane %v324_v61, 1 }
  0xa0   : > { %683 = vrot.lane.b32.xlu0 %v1433_v44, %s1212_s16  ;;  %687 = vrot.lane.b32.xlu1 %v1427_v43, %s1213_s18 }
  0xa1   : > { %689 = vrot.lane.b32.xlu2 %v1433_v44, %s1213_s18 }
  0xa2   : > { %v334_v11 = vpop.permute.xlu1 %333  ;;  %v330_v12 = vpop.permute.xlu0 %329 }
  0xa3   : > { %v339_v15 = vsel %vm337_vm5, %v330_v12, %v334_v11  ;;  %v341_v16 = vsel %vm337_vm5, %v334_v11, %v330_v12  ;;  %v1511_v17 = vpop.permute.xlu2 %426 }
  0xa4   : > { %v344_v20 = vmul.f32 %v339_v15, %v1467_v51  ;;  %v345_v21 = vmul.f32 %v341_v16, %v1470_v52 }
  0xa6   : > { %v346_v26 = vadd.f32 %v344_v20, %v342_v18  ;;  %v353_v27 = vadd.f32 %v345_v21, %v343_v19 }
  0xa8   : > { %v347_v28 = vrot.slane %v346_v26, 4  ;;  %v354_v29 = vrot.slane %v353_v27, 4 }
  0xaa   : > { %v348_v34 = vadd.f32 %v347_v28, %v346_v26  ;;  %v355_v35 = vadd.f32 %v354_v29, %v353_v27  ;;  %v367_v36 = vpop.permute.xlu1 %366  ;;  %v365_v37 = vpop.permute.xlu0 %364  ;;  %v326_v28 = vadd.f32 %v325_v9, %v324_v61  ;;  %v252_v61 = vld [vmem:[#allocation2] sm:$0x3] }
  0xab   : > { %v370_v38 = vsel %vm368_vm6, %v1447_v46, %v367_v36  ;;  %v372_v39 = vsel %vm368_vm6, %v367_v36, %v1447_v46  ;;  %v369_v40 = vsel %vm368_vm6, %v1439_v45, %v365_v37  ;;  %v371_v41 = vsel %vm368_vm6, %v365_v37, %v1439_v45  ;;  %v1530_v42 = vpop.permute.xlu2 %455 }
  0xac   : > { %v349_v53 = vrot.slane %v348_v34, 2  ;;  %v356_v54 = vrot.slane %v355_v35, 2  ;;  %v375_v55 = vmul.f32 %v370_v38, %v1467_v51  ;;  %v376_v56 = vmul.f32 %v372_v39, %v1470_v52 }
  0xad   : > { %v373_v57 = vmul.f32 %v369_v40, %v1461_v49  ;;  %v374_v46 = vmul.f32 %v371_v41, %v1464_v50 }
  0xae   : > { %v350_v0 = vadd.f32 %v349_v53, %v348_v34  ;;  %v357_v45 = vadd.f32 %v356_v54, %v355_v35 }
  0xaf   : > { %v377_v62 = vadd.f32 %v375_v55, %v373_v57  ;;  %v384_v63 = vadd.f32 %v376_v56, %v374_v46 }
  0xb0   : > { %v351_v15 = vrot.slane %v350_v0, 1  ;;  %v358_v16 = vrot.slane %v357_v45, 1 }
  0xb1   : > { %v378_v2 = vrot.slane %v377_v62, 4  ;;  %v385_v4 = vrot.slane %v384_v63, 4 }
  0xb2   : > { %v396_v5 = vpop.permute.xlu1 %395  ;;  %v394_v10 = vpop.permute.xlu0 %393  ;;  %v352_v31 = vadd.f32 %v351_v15, %v350_v0  ;;  %v359_v32 = vadd.f32 %v358_v16, %v357_v45 }
  0xb3   : > { %v379_v11 = vadd.f32 %v378_v2, %v377_v62  ;;  %v386_v12 = vadd.f32 %v385_v4, %v384_v63  ;;  %v400_v13 = vsel %vm399_vm7, %v1455_v47, %v396_v5  ;;  %v402_v14 = vsel %vm399_vm7, %v396_v5, %v1455_v47  ;;  %v1551_v24 = vpop.permute.xlu2 %484 }
  0xb4   : > { %v404_v18 = vmul.f32 %v400_v13, %v1461_v49  ;;  %v405_v19 = vmul.f32 %v402_v14, %v1464_v50  ;;  %v401_v22 = vsel %vm399_vm7, %v394_v10, %v1499_v3  ;;  %v403_v23 = vsel %vm399_vm7, %v1499_v3, %v394_v10 }
  0xb5   : > { %v380_v20 = vrot.slane %v379_v11, 2  ;;  %v387_v21 = vrot.slane %v386_v12, 2  ;;  %v319_v47 = vadd.f32 %v318_v8, %v317_v60  ;;  %v406_v26 = vmul.f32 %v401_v22, %v1467_v51 }
  0xb6   : > { %v407_v27 = vmul.f32 %v403_v23, %v1470_v52  ;;  %v275_v3 = vsel %vm274_vm1, %v263_v6, %v273_v25  ;;  %v549_v57 = vsel %vm274_vm1, %v326_v28, %v359_v32 }
  0xb7   : > { %v381_v29 = vadd.f32 %v380_v20, %v379_v11  ;;  %v388_v30 = vadd.f32 %v387_v21, %v386_v12  ;;  %v408_v33 = vadd.f32 %v406_v26, %v404_v18  ;;  %v548_v56 = vsel %vm274_vm1, %v319_v47, %v352_v31 }
  0xb8   : > { %v415_v34 = vadd.f32 %v407_v27, %v405_v19  ;;  %v277_v0 = vadd.f32 %v275_v3, %v252_v61 }
  0xb9   : > { %v382_v35 = vrot.slane %v381_v29, 1  ;;  %v389_v36 = vrot.slane %v388_v30, 1  ;;  %v409_v37 = vrot.slane %v408_v33, 4 }
  0xba   : > { %v416_v38 = vrot.slane %v415_v34, 4  ;;  %v425_v39 = vpop.permute.xlu1 %424  ;;  %v423_v40 = vpop.permute.xlu0 %422  ;;  %282 = vst.msk [vmem:[#allocation2] sm:$0x3] %vm1342_vm0, %v277_v0 }
  0xbb   : > { %v383_v41 = vadd.f32 %v382_v35, %v381_v29  ;;  %v390_v53 = vadd.f32 %v389_v36, %v388_v30  ;;  %v431_v54 = vsel %vm430_vm8, %v423_v40, %v1511_v17  ;;  %v433_v55 = vsel %vm430_vm8, %v1511_v17, %v423_v40  ;;  %v1567_v45 = vpop.permute.xlu2 %490 }
  0xbc   : > { %v410_v46 = vadd.f32 %v409_v37, %v408_v33  ;;  %v417_v58 = vadd.f32 %v416_v38, %v415_v34  ;;  %v435_v9 = vmul.f32 %v431_v54, %v1461_v49  ;;  %v436_v5 = vmul.f32 %v433_v55, %v1464_v50 }
  0xbd   : > { %v551_v59 = vsel %vm550_vm9, %v548_v56, %v383_v41  ;;  %v552_v60 = vsel %vm550_vm9, %v549_v57, %v390_v53 }
  0xbe   : > { %v411_v62 = vrot.slane %v410_v46, 2  ;;  %v418_v63 = vrot.slane %v417_v58, 2 }
  0xc0   : > { %v412_v2 = vadd.f32 %v411_v62, %v410_v46  ;;  %v419_v4 = vadd.f32 %v418_v63, %v417_v58 }
  0xc1   : > { %v612_v20 = vld [vmem:[#allocation2] sm:$0x3] }
  0xc2   : > { %v413_v17 = vrot.slane %v412_v2, 1  ;;  %v420_v6 = vrot.slane %v419_v4, 1  ;;  %v454_v7 = vpop.permute.xlu1 %453  ;;  %v429_v8 = vpop.permute.xlu0 %428  ;;  %v1584_v25 = vadd.f32 1e-06, %v612_v20 }
  0xc3   : > { %v432_v10 = vsel %vm430_vm8, %v425_v39, %v429_v8  ;;  %v434_v11 = vsel %vm430_vm8, %v429_v8, %v425_v39  ;;  %v1582_v23 = vpop.permute.xlu2 %519 }
  0xc4   : > { %v414_v12 = vadd.f32 %v413_v17, %v412_v2  ;;  %v421_v13 = vadd.f32 %v420_v6, %v419_v4  ;;  %v437_v1 = vmul.f32 %v432_v10, %v1467_v51  ;;  %v438_v14 = vmul.f32 %v434_v11, %v1470_v52 }
  0xc5   : > { %1054 = vrsqrt.f32 %v1584_v25  ;;  %vm620_vm15 = vweird.f32 %v1584_v25 }
  0xc6   : > { %v554_v15 = vsel %vm553_vm10, %v551_v59, %v414_v12  ;;  %v555_v16 = vsel %vm553_vm10, %v552_v60, %v421_v13  ;;  %v439_v18 = vadd.f32 %v437_v1, %v435_v9  ;;  %v446_v19 = vadd.f32 %v438_v14, %v436_v5 }
  0xc8   : > { %v440_v21 = vrot.slane %v439_v18, 4  ;;  %v447_v22 = vrot.slane %v446_v19, 4 }
  0xca   : > { %v441_v47 = vadd.f32 %v440_v21, %v439_v18  ;;  %v448_v26 = vadd.f32 %v447_v22, %v446_v19  ;;  %v460_v27 = vpop.permute.xlu1 %459  ;;  %v458_v28 = vpop.permute.xlu0 %457 }
  0xcb   : > { %v463_v29 = vsel %vm461_vm11, %v1530_v42, %v460_v27  ;;  %v465_v30 = vsel %vm461_vm11, %v460_v27, %v1530_v42  ;;  %v462_v31 = vsel %vm461_vm11, %v454_v7, %v458_v28  ;;  %v464_v32 = vsel %vm461_vm11, %v458_v28, %v454_v7  ;;  %v1055_v59 = vpop.eup %1054  ;;  %v575_v62 = vpop.permute.xlu2 %574 }
  0xcc   : > { %v442_v33 = vrot.slane %v441_v47, 2  ;;  %v449_v34 = vrot.slane %v448_v26, 2  ;;  %v468_v35 = vmul.f32 %v463_v29, %v1467_v51  ;;  %v469_v36 = vmul.f32 %v465_v30, %v1470_v52 }
  0xcd   : > { %v466_v3 = vmul.f32 %v462_v31, %v1461_v49  ;;  %v467_v37 = vmul.f32 %v464_v32, %v1464_v50  ;;  %v615_v17 = vmul.f32 %v1055_v59, %v1584_v25  ;;  %vm621_vm0 = vweird.f32 %v1055_v59 }
  0xce   : > { %v443_v38 = vadd.f32 %v442_v33, %v441_v47  ;;  %v450_v42 = vadd.f32 %v449_v34, %v448_v26  ;;  %vm622_vm2 = vmor %vm620_vm15, %vm621_vm0  ;;  %vm562_vm15 = vcmask 1045504   ;;  %vm565_vm0 = vcmask 1046528  }
  0xcf   : > { %v470_v39 = vadd.f32 %v468_v35, %v466_v3  ;;  %v477_v40 = vadd.f32 %v469_v36, %v467_v37  ;;  %v616_v11 = vmul.f32 %v1055_v59, %v615_v17 }
  0xd0   : > { %v444_v41 = vrot.slane %v443_v38, 1  ;;  %v451_v53 = vrot.slane %v450_v42, 1 }
  0xd1   : > { %v471_v54 = vrot.slane %v470_v39, 4  ;;  %v478_v55 = vrot.slane %v477_v40, 4 }
  0xd2   : > { %v445_v56 = vadd.f32 %v444_v41, %v443_v38  ;;  %v452_v57 = vadd.f32 %v451_v53, %v450_v42  ;;  %v489_v46 = vpop.permute.xlu1 %488  ;;  %v487_v58 = vpop.permute.xlu0 %486 }
  0xd3   : > { %v472_v60 = vadd.f32 %v471_v54, %v470_v39  ;;  %v479_v61 = vadd.f32 %v478_v55, %v477_v40  ;;  %v493_v21 = vsel %vm492_vm14, %v1551_v24, %v489_v46  ;;  %v494_v22 = vsel %vm492_vm14, %v487_v58, %v1567_v45 }
  0xd4   : > { %v557_v63 = vsel %vm556_vm12, %v554_v15, %v445_v56  ;;  %v558_v0 = vsel %vm556_vm12, %v555_v16, %v452_v57  ;;  %v1610_v15 = vpop.permute.xlu2 %651  ;;  %v617_v16 = vmul.f32 0.5, %v616_v11  ;;  %v495_v26 = vsel %vm492_vm14, %v489_v46, %v1551_v24 }
  0xd5   : > { %v473_v2 = vrot.slane %v472_v60, 2  ;;  %v480_v4 = vrot.slane %v479_v61, 2  ;;  %v496_v27 = vsel %vm492_vm14, %v1567_v45, %v487_v58  ;;  %v497_v29 = vmul.f32 %v493_v21, %v1461_v49 }
  0xd6   : > { %v618_v20 = vsub.f32 1.5, %v617_v16  ;;  %v499_v30 = vmul.f32 %v494_v22, %v1467_v51  ;;  %v498_v31 = vmul.f32 %v495_v26, %v1464_v50  ;;  %v500_v32 = vmul.f32 %v496_v27, %v1470_v52 }
  0xd7   : > { %v474_v6 = vadd.f32 %v473_v2, %v472_v60  ;;  %v481_v7 = vadd.f32 %v480_v4, %v479_v61  ;;  %v624_v24 = vmul.f32 0.5, %v1584_v25 }
  0xd8   : > { %v619_v47 = vmul.f32 %v1055_v59, %v618_v20  ;;  %v501_v38 = vadd.f32 %v499_v30, %v497_v29  ;;  %v508_v54 = vadd.f32 %v500_v32, %v498_v31 }
  0xd9   : > { %v475_v8 = vrot.slane %v474_v6, 1  ;;  %v482_v9 = vrot.slane %v481_v7, 1 }
  0xda   : > { %v518_v5 = vpop.permute.xlu1 %517  ;;  %v516_v10 = vpop.permute.xlu0 %515  ;;  %v623_v35 = vsel %vm622_vm2, %v1055_v59, %v619_v47  ;;  %v502_v61 = vrot.slane %v501_v38, 4  ;;  %v509_v2 = vrot.slane %v508_v54, 4 }
  0xdb   : > { %v476_v12 = vadd.f32 %v475_v8, %v474_v6  ;;  %v483_v13 = vadd.f32 %v482_v9, %v481_v7  ;;  %v625_v55 = vmul.f32 %v624_v24, %v623_v35  ;;  %v524_v56 = vsel %vm523_vm4, %v516_v10, %v1582_v23 }
  0xdc   : > { %v696_v28 = vpop.permute.xlu2 %695  ;;  %v526_v57 = vsel %vm523_vm4, %v1582_v23, %v516_v10  ;;  %v528_v4 = vmul.f32 %v524_v56, %v1461_v49  ;;  %v503_v10 = vadd.f32 %v502_v61, %v501_v38 }
  0xdd   : > { %v1605_v1 = vsel %vm559_vm13, %v557_v63, %v476_v12  ;;  %v1608_v14 = vsel %vm559_vm13, %v558_v0, %v483_v13  ;;  %v529_v17 = vmul.f32 %v526_v57, %v1464_v50  ;;  %v626_v23 = vmul.f32 %v625_v55, %v623_v35 }
  0xde   : > { %v510_v12 = vadd.f32 %v509_v2, %v508_v54  ;;  %v504_v27 = vrot.slane %v503_v10, 2 }
  0xdf   : > { %v627_v16 = vsub.f32 1.5, %v626_v23 }
  0xe0   : > { %v511_v29 = vrot.slane %v510_v12, 2  ;;  %v505_v23 = vadd.f32 %v504_v27, %v503_v10 }
  0xe2   : > { %v573_v18 = vpop.permute.xlu1 %572  ;;  %v522_v19 = vpop.permute.xlu0 %521 }
  0xe3   : > { %v525_v25 = vsel %vm523_vm4, %v518_v5, %v522_v19  ;;  %v527_v40 = vsel %vm523_vm4, %v522_v19, %v518_v5 }
  0xe4   : > { %v530_v59 = vmul.f32 %v525_v25, %v1467_v51  ;;  %v531_v60 = vmul.f32 %v527_v40, %v1470_v52  ;;  %v1657_v0 = vpop.permute.xlu2 %663 }
  0xe6   : > { %v532_v5 = vadd.f32 %v530_v59, %v528_v4 }
  0xe8   : > { %v533_v21 = vrot.slane %v532_v5, 4 }
  0xea   : > { %v579_v33 = vpop.permute.xlu1 %578  ;;  %v577_v34 = vpop.permute.xlu0 %576 }
  0xeb   : > { %v582_v45 = vsel %vm580_vm3, %v575_v62, %v579_v33  ;;  %v584_v36 = vsel %vm580_vm3, %v579_v33, %v575_v62  ;;  %v581_v3 = vsel %vm580_vm3, %v573_v18, %v577_v34  ;;  %v583_v37 = vsel %vm580_vm3, %v577_v34, %v573_v18 }
  0xec   : > { %v587_v42 = vmul.f32 %v582_v45, %v1467_v51  ;;  %v588_v39 = vmul.f32 %v584_v36, %v1470_v52  ;;  %v585_v41 = vmul.f32 %v581_v3, %v1461_v49  ;;  %v586_v53 = vmul.f32 %v583_v37, %v1464_v50 }
  0xed   : > { %v539_v51 = vadd.f32 %v531_v60, %v529_v17  ;;  %v1667_v34 = vmul.f32 %v627_v16, %v623_v35  ;;  %v534_v3 = vadd.f32 %v533_v21, %v532_v5 }
  0xee   : > { %v589_v46 = vadd.f32 %v587_v42, %v585_v41  ;;  %v596_v58 = vadd.f32 %v588_v39, %v586_v53  ;;  %v672_v39 = vpop.permute.xlu2 %671 }
  0xef   : > { %v540_v22 = vrot.slane %v539_v51, 4  ;;  %v804_v17 = vperm.slane %v1667_v34, 0 }
  0xf0   : > { %v590_v62 = vrot.slane %v589_v46, 4  ;;  %v597_v63 = vrot.slane %v596_v58, 4 }
  0xf1   : > { %v541_v37 = vadd.f32 %v540_v22, %v539_v51 }
  0xf2   : > { %v1661_v6 = vpop.permute.xlu0 %653  ;;  %v694_v7 = vpop.permute.xlu1 %693  ;;  %v591_v8 = vadd.f32 %v590_v62, %v589_v46  ;;  %v598_v9 = vadd.f32 %v597_v63, %v596_v58 }
  0xf3   : > { %v697_v13 = vsel %vm580_vm3, %v694_v7, %v696_v28  ;;  %v698_v49 = vsel %vm580_vm3, %v696_v28, %v694_v7  ;;  %v805_v7 = vperm.slane %v1667_v34, 1  ;;  %v656_v16 = vsel %vm337_vm5, %v1661_v6, %v1610_v15 }
  0xf4   : > { %v592_v52 = vrot.slane %v591_v8, 2  ;;  %v599_v11 = vrot.slane %v598_v9, 2  ;;  %v743_v19 = vrot.slane %v697_v13, 7  ;;  %v744_v20 = vrot.slane %v698_v49, 7 }
  0xf5   : > { %v747_v47 = vrot.slane %v697_v13, 6  ;;  %v748_v26 = vrot.slane %v698_v49, 6  ;;  %v751_v30 = vrot.slane %v697_v13, 5  ;;  %v752_v31 = vrot.slane %v698_v49, 5 }
  0xf6   : > { %v593_v50 = vadd.f32 %v592_v52, %v591_v8  ;;  %v600_v18 = vadd.f32 %v599_v11, %v598_v9  ;;  %v785_v45 = vsel %vm274_vm1, %v697_v13, %v743_v19  ;;  %v786_v36 = vsel %vm274_vm1, %v698_v49, %v744_v20  ;;  %v682_v21 = vpop.permute.xlu2 %681 }
  0xf7   : > { %v787_v38 = vsel %vm550_vm9, %v785_v45, %v747_v47  ;;  %v788_v42 = vsel %vm550_vm9, %v786_v36, %v748_v26  ;;  %v755_v25 = vrot.slane %v697_v13, 4  ;;  %v756_v40 = vrot.slane %v698_v49, 4 }
  0xf8   : > { %v594_v28 = vrot.slane %v593_v50, 1  ;;  %v601_v24 = vrot.slane %v600_v18, 1  ;;  %v759_v41 = vrot.slane %v697_v13, 3  ;;  %v760_v53 = vrot.slane %v698_v49, 3 }
  0xf9   : > { %v763_v54 = vrot.slane %v697_v13, 2  ;;  %v764_v35 = vrot.slane %v698_v49, 2  ;;  %v789_v55 = vsel %vm553_vm10, %v787_v38, %v751_v30  ;;  %v790_v56 = vsel %vm553_vm10, %v788_v42, %v752_v31 }
  0xfa   : > { %v658_v32 = vpop.permute.xlu0 %657  ;;  %v660_v33 = vpop.permute.xlu1 %659  ;;  %v595_v57 = vadd.f32 %v594_v28, %v593_v50  ;;  %v602_v46 = vadd.f32 %v601_v24, %v600_v18  ;;  %v791_v58 = vsel %vm556_vm12, %v789_v55, %v755_v25  ;;  %v792_v59 = vsel %vm556_vm12, %v790_v56, %v756_v40 }
  0xfb   : > { %v767_v60 = vrot.slane %v697_v13, 1  ;;  %v768_v61 = vrot.slane %v698_v49, 1  ;;  %v793_v62 = vsel %vm559_vm13, %v791_v58, %v759_v41  ;;  %v794_v63 = vsel %vm559_vm13, %v792_v59, %v760_v53 }
  0xfc   : > { %v795_v2 = vsel %vm562_vm15, %v793_v62, %v763_v54  ;;  %v796_v4 = vsel %vm562_vm15, %v794_v63, %v764_v35  ;;  %v512_v8 = vadd.f32 %v511_v29, %v510_v12  ;;  %v535_v11 = vrot.slane %v534_v3, 2 }
  0xfd   : > { %v797_v51 = vsel %vm565_vm0, %v795_v2, %v767_v60  ;;  %v798_v52 = vsel %vm565_vm0, %v796_v4, %v768_v61  ;;  %v542_v13 = vrot.slane %v541_v37, 2  ;;  %v655_v49 = vsel %vm337_vm5, %v1610_v15, %v1661_v6 }
  0xfe   : > { %v810_v10 = vmul.f32 %v804_v17, %v797_v51  ;;  %v811_v12 = vmul.f32 %v805_v7, %v798_v52  ;;  %v506_v50 = vrot.slane %v505_v23, 1  ;;  %v513_v18 = vrot.slane %v512_v8, 1 }
  0xff   : > { %v661_v19 = vsel %vm368_vm6, %v658_v32, %v660_v33  ;;  %v662_v20 = vsel %vm368_vm6, %v660_v33, %v658_v32  ;;  %v536_v22 = vadd.f32 %v535_v11, %v534_v3  ;;  %v543_v47 = vadd.f32 %v542_v13, %v541_v37 }
 0x100   : > { %v814_v26 = vmul.f32 %v810_v10, %v595_v57  ;;  %v815_v15 = vmul.f32 %v811_v12, %v602_v46  ;;  %v701_v6 = vrot.slane %v655_v49, 7  ;;  %v702_v27 = vrot.slane %v656_v16, 7 }
 0x101   : > { %v707_v31 = vrot.slane %v661_v19, 6  ;;  %v708_v28 = vrot.slane %v662_v20, 6  ;;  %v514_v42 = vadd.f32 %v513_v18, %v512_v8  ;;  %v537_v41 = vrot.slane %v536_v22, 1 }
 0x102   : > { %v666_v9 = vpop.permute.xlu0 %665  ;;  %v670_v5 = vpop.permute.xlu1 %669  ;;  %v818_v24 = vmax.f32 %v814_v26, 0.0  ;;  %v819_v32 = vmax.f32 %v815_v15, 0.0  ;;  %v771_v25 = vsel %vm274_vm1, %v1427_v43, %v701_v6  ;;  %v772_v40 = vsel %vm274_vm1, %v1433_v44, %v702_v27 }
 0x103   : > { %v667_v29 = vsel %vm399_vm7, %v1657_v0, %v666_v9  ;;  %v668_v30 = vsel %vm399_vm7, %v666_v9, %v1657_v0  ;;  %v673_v37 = vsel %vm430_vm8, %v670_v5, %v672_v39  ;;  %v674_v38 = vsel %vm430_vm8, %v672_v39, %v670_v5  ;;  %v690_v44 = vpop.permute.xlu2 %689 }
 0x104   : > { %v713_v36 = vrot.slane %v667_v29, 5  ;;  %v714_v3 = vrot.slane %v668_v30, 5  ;;  %822 = vst [vmem:[%s1712_s28 + $0x10] sm:$0xff] %v818_v24  ;;  %v507_v0 = vadd.f32 %v506_v50, %v505_v23  ;;  %v544_v53 = vrot.slane %v543_v47, 1 }
 0x105   : > { %823 = vst [vmem:[%s1712_s28 + $0x18] sm:$0xff] %v819_v32  ;;  %v773_v54 = vsel %vm550_vm9, %v771_v25, %v707_v31  ;;  %v774_v39 = vsel %vm550_vm9, %v772_v40, %v708_v28  ;;  %v719_v35 = vrot.slane %v673_v37, 4  ;;  %v720_v55 = vrot.slane %v674_v38, 4 }
 0x106   : > { %v775_v43 = vsel %vm553_vm10, %v773_v54, %v713_v36  ;;  %v776_v46 = vsel %vm553_vm10, %v774_v39, %v714_v3  ;;  %v538_v58 = vadd.f32 %v537_v41, %v536_v22  ;;  %v545_v59 = vadd.f32 %v544_v53, %v543_v47 }
 0x107   : > { %v563_v62 = vsel %vm562_vm15, %v1605_v1, %v507_v0  ;;  %v564_v63 = vsel %vm562_vm15, %v1608_v14, %v514_v42  ;;  %v777_v2 = vsel %vm556_vm12, %v775_v43, %v719_v35  ;;  %v778_v4 = vsel %vm556_vm12, %v776_v46, %v720_v55 }
 0x108   : > { %v566_v49 = vsel %vm565_vm0, %v563_v62, %v538_v58  ;;  %v567_v16 = vsel %vm565_vm0, %v564_v63, %v545_v59 }
 0x10a   : > { %v676_v33 = vpop.permute.xlu0 %675  ;;  %v678_v45 = vpop.permute.xlu1 %677 }
 0x10b   : > { %v679_v56 = vsel %vm461_vm11, %v676_v33, %v678_v45  ;;  %v680_v57 = vsel %vm461_vm11, %v678_v45, %v676_v33 }
 0x10c   : > { %v725_v60 = vrot.slane %v679_v56, 3  ;;  %v726_v61 = vrot.slane %v680_v57, 3 }
 0x10e   : > { %v779_v10 = vsel %vm559_vm13, %v777_v2, %v725_v60  ;;  %v780_v12 = vsel %vm559_vm13, %v778_v4, %v726_v61 }
 0x112   : > { %v684_v23 = vpop.permute.xlu0 %683  ;;  %v688_v8 = vpop.permute.xlu1 %687 }
 0x113   : > { %v685_v9 = vsel %vm492_vm14, %v682_v21, %v684_v23  ;;  %v686_v5 = vsel %vm492_vm14, %v684_v23, %v682_v21  ;;  %v691_v51 = vsel %vm523_vm4, %v688_v8, %v690_v44  ;;  %v692_v1 = vsel %vm523_vm4, %v690_v44, %v688_v8 }
 0x114   : > { %v731_v14 = vrot.slane %v685_v9, 2  ;;  %v732_v52 = vrot.slane %v686_v5, 2  ;;  %v737_v11 = vrot.slane %v691_v51, 1  ;;  %v738_v13 = vrot.slane %v692_v1, 1 }
 0x116   : > { %v781_v50 = vsel %vm562_vm15, %v779_v10, %v731_v14  ;;  %v782_v48 = vsel %vm562_vm15, %v780_v12, %v732_v52 }
 0x117   : > { %v783_v18 = vsel %vm565_vm0, %v781_v50, %v737_v11  ;;  %v784_v19 = vsel %vm565_vm0, %v782_v48, %v738_v13 }
 0x118   : > { %v808_v20 = vmul.f32 %v804_v17, %v783_v18  ;;  %v809_v21 = vmul.f32 %v805_v7, %v784_v19 }
 0x11a   : > { %v812_v22 = vmul.f32 %v808_v20, %v566_v49  ;;  %v813_v47 = vmul.f32 %v809_v21, %v567_v16 }
 0x11c   : > { %v816_v26 = vmax.f32 %v812_v22, 0.0  ;;  %v817_v15 = vmax.f32 %v813_v47, 0.0 }
 0x11e   : > { %820 = vst [vmem:[%s1712_s28] sm:$0xff] %v816_v26 }
 0x11f   : > { %821 = vst [vmem:[%s1712_s28 + $0x8] sm:$0xff] %v817_v15 }
 0x120   : > { %1143 = shalt.err (!%p1140_p13)
}
 0x121   : > { %s1215_s3 = smov 256   ;;  %s1216_s16 = smov 16  }
 0x122   : > { %976 = dma.vmem_to_hbm [thread:$0]  (%p1283_p9), %s838_s4, 512, %s840_s27, %s825_s5, %s1215_s3, %s1215_s3, %s1216_s16  }
 0x123 PF: > { %s854_s18 = sand.u32 1, %s1182_s9   ;;  %p986_p0 = pnand %p953_p12, %p1290_p11 }
 0x124   : > { %s855_s20 = scalar_lea.sflag [#allocation6], %s854_s18 }
 0x125   : > { %p987_p1 = pneg %p986_p0 }
 0x127   : > { %1177 = dma.done.wait (%p987_p1), %s855_s20, 512  }
 0x128   : > { %1179 = vsyncadd (%p987_p1), %s855_s20, 4294966784  ;;  %s21_s14 = sadd.s32 1, %s1202_s14   ;;  %s1805_s9 = smov %s1186_s10 }
 0x129   : > { %p18_p2 = scmp.ge.s32.totalorder %s21_s14, 4   ;;  %s1806_s10 = smov %s1190_s11 }
 0x12a   : > { %s1807_s11 = smov %s1288_s23  ;;  %s1808_s12 = smov %s1198_s13 }
 0x12b   : > { %s1809_s13 = smov %s1811_s17  ;;  %20 = sbr.rel (!%p18_p2) target bundleno = 8 (0x8), region = 94 }
 0x130   :  { %861 = vsyncpa [#allocation5], 1 }
 0x131   :  { %863 = vsyncpa [#allocation5 + $0x1], 1 }
 0x132   :  { %864 = vsyncpa [#allocation8], 1 }
 0x133   :  { %866 = vsyncpa [#allocation8 + $0x1], 1 }
 0x134   :  { %867 = vsyncpa [#allocation6], 1 }
 0x135   :  { %869 = vsyncpa [#allocation6 + $0x1], 1 }

</bundles_post_ra>
